<compile_context>
chip_gen: v7x
topology: tpu7x:2x2x1
jax: 0.10.0
libtpu: 0.0.40
codegen_flags: <defaults>
</compile_context>

<pallas_src>
import jax
import jax.numpy as jnp
from jax.experimental import pallas as pl
from jax.experimental.pallas import tpu as pltpu


_MASK_FILL = -10000000.0  # plain Python float -> created in-trace, never captured


def _round_up(x: int, m: int) -> int:
    return ((x + m - 1) // m) * m


def _max_pool_kernel(x_ref, mask_ref, out_ref):
    # x_ref:    (Bb, Tt, Dt) input dtype -- tokens on sublanes, features on lanes
    # mask_ref: (Bb, Tt, 1)  float; zero-padded along T so garbage rows of a
    #                        partial x block are always replaced by the fill
    # out_ref:  (Bb, Dt)     input dtype, running-max accumulator (same block across t)
    t = pl.program_id(2)

    x = x_ref[...]
    keep = mask_ref[...] > 0.0                      # (Bb, Tt, 1) bool, lane-broadcast
    masked = jnp.where(keep, x, _MASK_FILL)         # fill rounds into input dtype (as torch)
    part = jnp.max(masked, axis=1)                  # (Bb, Dt): reduce over tokens

    @pl.when(t == 0)
    def _():
        out_ref[...] = part

    @pl.when(t > 0)
    def _():
        out_ref[...] = jnp.maximum(out_ref[...], part)


def max_pooler_aggregator(input_tensors: jax.Array, mask: jax.Array) -> jax.Array:
    """Masked max pooling over the token axis.

    input_tensors: (B, T, D), native dtype (streamed as-is, no wrapper copy)
    mask:          (B, T), 1 = keep, 0 = masked
    returns:       (B, D), same dtype as input (matches torch.max semantics)
    """
    B, T, D = input_tensors.shape
    assert mask.shape == (B, T)

    dtype = input_tensors.dtype
    itemsize = jnp.dtype(dtype).itemsize

    # Mask kept narrow: its (Bb, Tt, 1) VMEM block is lane-padded to 128, so dtype
    # choice matters for the VMEM budget, not for correctness (values are 0/1).
    mask_dtype = dtype if (jnp.issubdtype(dtype, jnp.floating) and itemsize <= 4) else jnp.float32
    mask_itemsize = jnp.dtype(mask_dtype).itemsize

    # ---- tile selection (cdiv grid: no padded copy of the input) -------------
    BUDGET = 4 << 20  # per-buffer (x + mask) budget; 2x buffers fit v5e's 16 MiB scoped VMEM

    # Batch block: multiple of 8 (legal output sublane dim) or full B. Grow it when
    # T*D per row is tiny so every grid step still moves ~1 MiB.
    if B < 8:
        Bb = B
    else:
        Bb = 8
        row_bytes = _round_up(T, 8) * _round_up(D, 128) * itemsize
        while Bb < 64 and Bb * 2 <= B and Bb * row_bytes < (1 << 20):
            Bb *= 2

    # Feature block: full D whenever it fits (fully contiguous HBM rows, no mask
    # re-fetch across d, fewest grid steps); otherwise largest lane-aligned width.
    D_vmem = _round_up(D, 128)
    if Bb * 8 * D_vmem * itemsize <= BUDGET:
        Dt = D
    else:
        Dt = max(128, (BUDGET // (Bb * 8 * itemsize)) // 128 * 128)
    Dt_vmem = _round_up(Dt, 128)

    # Token block: as many rows as fit the budget, counting both the x tile and the
    # lane-padded (x128) mask tile; multiple of 8 unless we take the whole T.
    per_row = Bb * (Dt_vmem * itemsize + 128 * mask_itemsize)
    max_rows = max(8, BUDGET // per_row)
    Tt = T if T <= max_rows else (max_rows // 8) * 8

    nb = pl.cdiv(B, Bb)
    nd = pl.cdiv(D, Dt)
    nt = pl.cdiv(T, Tt)

    # Only the tiny mask is padded (zeros along T) so partial-T x garbage is masked
    # out in-kernel. B/D tails need nothing: output writeback is clamped to (B, D).
    mask3 = mask.astype(mask_dtype).reshape(B, T, 1)
    T_m = nt * Tt
    if T_m != T:
        mask3 = jnp.pad(mask3, ((0, 0), (0, T_m - T), (0, 0)))

    # Explicit VMEM limit sized from the real double-buffered working set.
    x_buf = Bb * _round_up(Tt, 8) * Dt_vmem * itemsize
    m_buf = Bb * _round_up(Tt, 8) * 128 * mask_itemsize
    o_buf = _round_up(Bb, 8) * Dt_vmem * itemsize
    vmem_limit = min(max(2 * (x_buf + m_buf) + 2 * o_buf + (4 << 20), 16 << 20), 32 << 20)

    out = pl.pallas_call(
        _max_pool_kernel,
        out_shape=jax.ShapeDtypeStruct((B, D), dtype),
        grid_spec=pltpu.PrefetchScalarGridSpec(
            num_scalar_prefetch=0,
            grid=(nb, nd, nt),
            in_specs=[
                pl.BlockSpec((Bb, Tt, Dt), lambda b, d, t: (b, t, d)),
                pl.BlockSpec((Bb, Tt, 1), lambda b, d, t: (b, t, 0)),
            ],
            out_specs=pl.BlockSpec((Bb, Dt), lambda b, d, t: (b, d)),
        ),
        compiler_params=pltpu.CompilerParams(
            # b/d tiles are independent (megacore / v7x 2xTC); token axis is the
            # running-max reduction -> arbitrary, placed last.
            dimension_semantics=("parallel", "parallel", "arbitrary"),
            vmem_limit_bytes=int(vmem_limit),
        ),
        cost_estimate=pl.CostEstimate(
            flops=2 * B * T * D,
            transcendentals=0,
            bytes_accessed=(
                B * T * D * itemsize + B * T_m * mask_itemsize + B * D * itemsize
            ),
        ),
    )(input_tensors, mask3)
    return out


if __name__ == "__main__":
    key = jax.random.PRNGKey(0)
    k_x, _ = jax.random.split(key)

    # (batch, num_tokens, input_dim); deliberately non-aligned T/D.
    B, T, D = 2, 10, 96
    x = jax.random.normal(k_x, (B, T, D), dtype=jnp.float32).astype(jnp.bfloat16)
    lengths = jnp.array([6, 10], dtype=jnp.int32)
    mask = (jnp.arange(T)[None, :] < lengths[:, None]).astype(jnp.float32)

    out = jax.block_until_ready(max_pooler_aggregator(x, mask))

    # Reference: same math as the torch module (masked fill + max in the input dtype).
    fill = jnp.asarray(_MASK_FILL, dtype=x.dtype)
    ref = jnp.max(jnp.where(mask[:, :, None] > 0, x, fill), axis=1)

    assert out.shape == (B, D)
    assert out.dtype == x.dtype
    assert jnp.allclose(out.astype(jnp.float32), ref.astype(jnp.float32), atol=1e-6, rtol=0.0), \
        "mismatch vs reference"

    print("KERNEL_OK")
</pallas_src>

<mosaic_0001>
module attributes {stable_mosaic.version = 11 : i64} {
  func.func @_max_pool_kernel(%arg0: i32, %arg1: i32, %arg2: i32, %arg3: memref<2x10x96xbf16, #tpu.memory_space<vmem>>, %arg4: memref<2x10x1xbf16, #tpu.memory_space<vmem>>, %arg5: memref<2x96xbf16, #tpu.memory_space<vmem>>) attributes {dimension_semantics = [#tpu.dimension_semantics<parallel>, #tpu.dimension_semantics<parallel>, #tpu.dimension_semantics<arbitrary>], iteration_bounds = array<i64: 1, 1, 1>, scalar_prefetch = 0 : i64, scratch_operands = 0 : i64, tpu.core_type = #tpu.core_type<tc>, window_params = [{transform_indices = @transform_0, window_bounds = array<i64: 2, 10, 96>}, {transform_indices = @transform_1, window_bounds = array<i64: 2, 10, 1>}, {transform_indices = @transform_2, window_bounds = array<i64: 2, 96>}]} {
    %c0 = arith.constant 0 : index
    %c0_0 = arith.constant 0 : index
    %c0_1 = arith.constant 0 : index
    %0 = vector.load %arg3[%c0, %c0_0, %c0_1] : memref<2x10x96xbf16, #tpu.memory_space<vmem>>, vector<2x10x96xbf16>
    %c0_2 = arith.constant 0 : index
    %c0_3 = arith.constant 0 : index
    %c0_4 = arith.constant 0 : index
    %1 = vector.load %arg4[%c0_2, %c0_3, %c0_4] : memref<2x10x1xbf16, #tpu.memory_space<vmem>>, vector<2x10x1xbf16>
    %cst = arith.constant 0.000000e+00 : bf16
    %2 = vector.broadcast %cst : bf16 to vector<2x10x1xbf16>
    %3 = arith.cmpf ogt, %1, %2 : vector<2x10x1xbf16>
    %cst_5 = arith.constant -1.000000e+07 : f32
    %4 = arith.truncf %cst_5 : f32 to bf16
    %5 = vector.shape_cast %3 : vector<2x10x1xi1> to vector<2x10x1xi1>
    %6 = vector.broadcast %5 : vector<2x10x1xi1> to vector<2x10x96xi1>
    %7 = vector.broadcast %4 : bf16 to vector<2x10x96xbf16>
    %8 = arith.select %6, %0, %7 : vector<2x10x96xi1>, vector<2x10x96xbf16>
    %cst_6 = arith.constant dense<0xFF80> : vector<2x96xbf16>
    %9 = vector.multi_reduction <maximumf>, %8, %cst_6 [1] : vector<2x10x96xbf16> to vector<2x96xbf16>
    %c0_i32 = arith.constant 0 : i32
    %10 = arith.cmpi eq, %arg2, %c0_i32 : i32
    %11 = arith.extui %10 : i1 to i32
    %c0_i32_7 = arith.constant 0 : i32
    %12 = arith.cmpi ne, %11, %c0_i32_7 : i32
    scf.if %12 {
      %c0_10 = arith.constant 0 : index
      %c0_11 = arith.constant 0 : index
      %16 = vector.load %arg5[%c0_10, %c0_11] : memref<2x96xbf16, #tpu.memory_space<vmem>>, vector<2x96xbf16>
      tpu.vector_store %arg5[%c0_10, %c0_11], %9 {strides = array<i32>} : memref<2x96xbf16, #tpu.memory_space<vmem>>, vector<2x96xbf16>,
    } else {
    }
    %c0_i32_8 = arith.constant 0 : i32
    %13 = arith.cmpi sgt, %arg2, %c0_i32_8 : i32
    %14 = arith.extui %13 : i1 to i32
    %c0_i32_9 = arith.constant 0 : i32
    %15 = arith.cmpi ne, %14, %c0_i32_9 : i32
    scf.if %15 {
      %c0_10 = arith.constant 0 : index
      %c0_11 = arith.constant 0 : index
      %16 = vector.load %arg5[%c0_10, %c0_11] : memref<2x96xbf16, #tpu.memory_space<vmem>>, vector<2x96xbf16>
      %17 = arith.maximumf %16, %9 : vector<2x96xbf16>
      %c0_12 = arith.constant 0 : index
      %c0_13 = arith.constant 0 : index
      %18 = vector.load %arg5[%c0_12, %c0_13] : memref<2x96xbf16, #tpu.memory_space<vmem>>, vector<2x96xbf16>
      tpu.vector_store %arg5[%c0_12, %c0_13], %17 {strides = array<i32>} : memref<2x96xbf16, #tpu.memory_space<vmem>>, vector<2x96xbf16>,
    } else {
    }
    return
  }
  func.func @transform_0(%arg0: i32, %arg1: i32, %arg2: i32) -> (i32, i32, i32) {
    %c0_i32 = arith.constant 0 : i32
    return %arg0, %arg2, %arg1 : i32, i32, i32
  }
  func.func @transform_1(%arg0: i32, %arg1: i32, %arg2: i32) -> (i32, i32, i32) {
    %c0_i32 = arith.constant 0 : i32
    %c0_i32_0 = arith.constant 0 : i32
    return %arg0, %arg2, %c0_i32 : i32, i32, i32
  }
  func.func @transform_2(%arg0: i32, %arg1: i32, %arg2: i32) -> (i32, i32) {
    %c0_i32 = arith.constant 0 : i32
    return %arg0, %arg1 : i32, i32
  }
}

</mosaic_0001>

<bundles_post_ra>
// kernel: tpu_custom_call.1
= control target key start
LH: loop header
LB: loop body
LE: loop exit
PB: predicated region body
PF: predicated region fallthrough
CT: control target
= control target key end

     0   :  { %v338_v2 = vmov 0   ;;  %s393_s0 = inlined_call_operand.vmem [shape: bf16[2,10,96], index: 0, kind: input, shape index: {}]   ;;  %s394_s1 = inlined_call_operand.vmem [shape: bf16[2,10,1], index: 1, kind: input, shape index: {}]   ;;  %s395_s2 = inlined_call_operand.hbm [shape: bf16[2,96], index: 2, kind: output, shape index: {}]  }
   0x1   :  { %v22_v0 = vld [vmem:[%s394_s1 + $0x8] sm:$0xf]  ;;  %v20_v1 = vld [vmem:[%s394_s1] sm:$0xf]  ;;  %313 = vset.pattern.permute.xlu1 %v338_v2  ;;  %312 = vset.pattern.permute.xlu0 %v338_v2  ;;  %v23_v3 = vld [vmem:[%s394_s1 + $0xc] sm:$0x1] }
   0x2   :  { %vm26_vm0 = vcmp.gt.bf16.partialorder %v22_v0, 0  ;;  %vm24_vm1 = vcmp.gt.bf16.partialorder %v20_v1, 0  ;;  %v21_v4 = vld [vmem:[%s394_s1 + $0x4] sm:$0x1]  ;;  %vm27_vm2 = vcmp.gt.bf16.partialorder %v23_v3, 0 }
   0x3   :  { %v40_v5 = vsel %vm26_vm0, 65537, %v338_v2  ;;  %v38_v6 = vsel %vm24_vm1, 65537, %v338_v2  ;;  %vm25_vm3 = vcmp.gt.bf16.partialorder %v21_v4, 0 }
   0x4   :  { %7 = vsyncpa [#allocation3], 0  ;;  %v44_v7 = vunpack.c.l.b16 %v40_v5  ;;  %v42_v8 = vunpack.c.l.b16 %v38_v6  ;;  %v41_v9 = vsel %vm27_vm2, 65537, %v338_v2  ;;  %v39_v10 = vsel %vm25_vm3, 65537, %v338_v2  ;;  %v18_v19 = vld [vmem:[%s393_s0 + $0x8] sm:$0xf] }
   0x5   :  { %v45_v11 = vunpack.c.l.b16 %v41_v9  ;;  %v43_v12 = vunpack.c.l.b16 %v39_v10  ;;  %v19_v21 = vld [vmem:[%s393_s0 + $0xc] sm:$0x1]  ;;  %v16_v23 = vld [vmem:[%s393_s0] sm:$0xf]  ;;  %v17_v24 = vld [vmem:[%s393_s0 + $0x4] sm:$0x1]  ;;  %v129_v43 = vlaneseq }
   0x6   :  { %vm48_vm4 = vcmp.ne.s32.totalorder %v44_v7, 0  ;;  %vm46_vm5 = vcmp.ne.s32.totalorder %v42_v8, 0  ;;  %vm92_vm15 = vcmask 782336   ;;  %v339_v41 = vmov 1966171168   ;;  %s341_s0 = smov [#allocation2]  }
   0x7   :  { %v52_v13 = vsel %vm48_vm4, 1, %v338_v2  ;;  %v50_v14 = vsel %vm46_vm5, 1, %v338_v2  ;;  %vm49_vm6 = vcmp.ne.s32.totalorder %v45_v11, 0  ;;  %vm47_vm7 = vcmp.ne.s32.totalorder %v43_v12, 0  ;;  %s298_s24 = sshll.u32 %s341_s0, 4  ;;  %s299_s24 = int_to_ptr.vmem [resolvable:$true] %s298_s24 }
   0x8   :  { %61 = vperm.xlu0 %312, %v52_v13   ;;  %55 = vperm.xlu1 %313, %v50_v14   ;;  %v53_v15 = vsel %vm49_vm6, 1, %v338_v2  ;;  %v51_v16 = vsel %vm47_vm7, 1, %v338_v2  ;;  %v127_v42 = vunpack.c.l.s4 %v339_v41  ;;  %v130_v49 = vshrl.u32 %v129_v43, 7  ;;  %s314_s25 = scalar_lea.vmem %s299_s24, 16  ;;  %s318_s26 = scalar_lea.vmem %s299_s24, 32 }
   0x9   :  { %v340_v51 = vmov 1935823168   ;;  %vm185_vm1 = vcmask 1041409   ;;  %vm203_vm2 = vcmask 778240   ;;  %p315_p0 = scmp.ne.s32.totalorder %s299_s24, %s314_s25  ;;  %p319_p1 = scmp.lt.s32.totalorder %s299_s24, %s299_s24 }
   0xa   :  { %v128_v48 = vunpack.c.0.s8 %v127_v42  ;;  %v155_v52 = vunpack.c.l.s4 %v340_v51  ;;  %p320_p2 = scmp.lt.s32.totalorder %s318_s26, %s314_s25 }
   0xc   :  { %64 = vperm.xlu0 %312, %v53_v15   ;;  %58 = vperm.xlu1 %313, %v51_v16   ;;  %v131_v56 = vsub.s32 %v128_v48, %v130_v49  ;;  %v156_v58 = vunpack.c.0.s8 %v155_v52  ;;  %p321_p3 = por %p320_p2, %p319_p1 }
   0xe   :  { %v159_v63 = vsub.s32 %v156_v58, %v130_v49  ;;  %p322_p4 = pnand %p321_p3, %p315_p0 }
  0x87   :  { %v62_v17 = vpop.permute.xlu0 %61  ;;  %v56_v18 = vpop.permute.xlu1 %55 }
  0x88   :  { %vm68_vm8 = vcmp.eq.s32.totalorder %v62_v17, 1  ;;  %vm66_vm9 = vcmp.eq.s32.totalorder %v56_v18, 1 }
  0x89   :  { %vm76_vm10 = vmpackc.low %vm68_vm8, %vm68_vm8 }
  0x8a   :  { %vm74_vm11 = vmpackc.low %vm66_vm9, %vm66_vm9  ;;  %v80_v25 = vsel %vm76_vm10, %v18_v19, -10079001.0 }
  0x8b   :  { %v65_v20 = vpop.permute.xlu0 %64  ;;  %v59_v22 = vpop.permute.xlu1 %58  ;;  %v78_v27 = vsel %vm74_vm11, %v16_v23, -10079001.0 }
  0x8c   :  { %vm69_vm12 = vcmp.eq.s32.totalorder %v65_v20, 1  ;;  %vm67_vm13 = vcmp.eq.s32.totalorder %v59_v22, 1 }
  0x8d   :  { %vm77_vm14 = vmpackc.low %vm69_vm12, %vm69_vm12 }
  0x8e   :  { %v81_v26 = vsel %vm77_vm14, %v19_v21, -10079001.0  ;;  %vm75_vm0 = vmpackc.low %vm67_vm13, %vm67_vm13 }
  0x8f   :  { %v307_v28 = vcombine.low %v80_v25, %v81_v26  ;;  %v79_v29 = vsel %vm75_vm0, %v17_v24, -10079001.0 }
  0x90   :  { %v306_v30 = vcombine.low %v78_v27, %v79_v29 }
  0x91   :  { %v108_v31 = vsel %vm92_vm15, %v307_v28, 4286644096 }
  0x92   :  { %v110_v32 = vunpack.i.l.bf16 %v108_v31  ;;  %v111_v33 = vunpack.i.h.bf16 %v108_v31  ;;  %v95_v34 = vsel %vm92_vm15, %v306_v30, 4286644096 }
  0x93   :  { %v97_v35 = vunpack.i.l.bf16 %v95_v34  ;;  %v98_v36 = vunpack.i.h.bf16 %v95_v34 }
  0x94   :  { %v112_v37 = vmax.f32 %v110_v32, %v111_v33 }
  0x95   :  { %v99_v38 = vmax.f32 %v97_v35, %v98_v36 }
  0x96   :  { %v113_v39 = vrot.slane %v112_v37, 4 }
  0x97   :  { %v100_v40 = vrot.slane %v99_v38, 4 }
  0x98   :  { %v114_v44 = vmax.f32 %v112_v37, %v113_v39 }
  0x99   :  { %v101_v45 = vmax.f32 %v99_v38, %v100_v40 }
  0x9a   :  { %v115_v46 = vrot.slane %v114_v44, 2 }
  0x9b   :  { %v102_v47 = vrot.slane %v101_v45, 2 }
  0x9c   :  { %v116_v50 = vmax.f32 %v114_v44, %v115_v46 }
  0x9d   :  { %v103_v53 = vmax.f32 %v101_v45, %v102_v47 }
  0x9e   :  { %v117_v54 = vrot.slane %v116_v50, 1 }
  0x9f   :  { %v104_v55 = vrot.slane %v103_v53, 1 }
  0xa0   :  { %v118_v57 = vmax.f32 %v116_v50, %v117_v54 }
  0xa1   :  { %v105_v59 = vmax.f32 %v103_v53, %v104_v55 }
  0xa2   :  { %v119_v60 = vpack.i.bf16 %v118_v57, %v118_v57 }
  0xa3   :  { %v106_v61 = vpack.i.bf16 %v105_v59, %v105_v59 }
  0xa4   :  { %v146_v62 = vrot.slane %v119_v60, %v131_v56 }
  0xa5   :  { %v132_v0 = vrot.slane %v106_v61, %v131_v56 }
  0xa6   :  { %v153_v1 = vrot.slane %v146_v62, %v131_v56 }
  0xa7   :  { %v139_v2 = vrot.slane %v132_v0, %v131_v56 }
  0xa8   :  { %v174_v3 = vrot.slane %v153_v1, %v159_v63 }
  0xa9   :  { %v160_v4 = vrot.slane %v139_v2, %v159_v63 }
  0xaa   :  { %v181_v5 = vrot.slane %v174_v3, %v159_v63 }
  0xab   :  { %v167_v6 = vrot.slane %v160_v4, %v159_v63 }
  0xac   :  { %v183_v7 = vunpack.c.l.b16 %v181_v5 }
  0xad   :  { %v182_v8 = vunpack.c.l.b16 %v167_v6 }
  0xae   :  { %v184_v9 = vrot.slane %v183_v7, 7 }
  0xb0   :  { %v186_v10 = vsel %vm185_vm1, %v184_v9, %v182_v8 }
  0xb1   :  { %v187_v11 = vpack.c.b16 %v186_v10, %v186_v10 }
  0xb3   :  { %v194_v12 = vrot.slane %v187_v11, %v131_v56 }
  0xb5   :  { %v201_v13 = vrot.slane %v194_v12, %v131_v56 }
  0xb7   :  { %204 = vst.msk [vmem:[#allocation2] sm:$0x1] %vm203_vm2, %v201_v13 }
  0xb8   :  { %325 = shalt.err (!%p322_p4)
}
  0xb9   :  { %s326_s29 = scalar_lea.hbm %s395_s2, 16 }
  0xba   :  { %p327_p5 = scmp.ne.s32.totalorder %s395_s2, %s326_s29  ;;  %p330_p6 = scmp.lt.u32.totalorder %s326_s29, %s395_s2 }
  0xbc   :  { %p332_p7 = pnand %p330_p6, %p327_p5 }
  0xbe   :  { %335 = shalt.err (!%p332_p7)
}
  0xbf   :  { %301 = dma.vmem_to_hbm [thread:$0]  %s299_s24, 16, %s395_s2, [#allocation3]  }
  0xc0   :  { %336 = dma.done.wait [#allocation3], 16  }
  0xc1   :  { %337 = vsyncadd [#allocation3], 4294967280 }
  0xc2   :  { %305 = vsyncpa [#allocation3], 1 }

</bundles_post_ra>
